<compile_context>
chip_gen: v7x
topology: tpu7x:2x2x1
jax: 0.10.0
libtpu: 0.0.40
codegen_flags: <defaults>
</compile_context>

<pallas_src>
import jax
import jax.numpy as jnp
from jax import lax
from jax.experimental import pallas as pl
from jax.experimental.pallas import tpu as pltpu


def _round_up(x: int, m: int) -> int:
    return (x + m - 1) // m * m


def fce_kernel(f_ref, g_ref, gT_ref, wf_ref, wrh_ref, b_ref, out_ref):
    f = f_ref[...].astype(jnp.float32)                    # (TN, Dp)
    f_bf = f.astype(jnp.bfloat16)
    Dp = f_ref.shape[1]
    K = g_ref.shape[0]                                    # static at trace time

    # Loop-invariant half of the LSTM pre-activation: f @ W_f_all + bias.
    # One wide (TN, 4*Dp) matmul instead of 4 per-gate ones.
    gate_f = (jnp.dot(f_bf, wf_ref[...], preferred_element_type=jnp.float32)
              + b_ref[...].astype(jnp.float32))           # (TN, 4*Dp)

    def step(_, carry):
        h, c = carry
        h_bf = h.astype(jnp.bfloat16)

        # Attention read over the support set (pre-transposed G^T -> no XLU).
        logit = jnp.dot(h_bf, gT_ref[...],
                        preferred_element_type=jnp.float32)          # (TN, K)
        m = jnp.max(logit, axis=1, keepdims=True)
        e = jnp.exp(logit - m)
        a = e * pl.reciprocal(jnp.sum(e, axis=1, keepdims=True), approx=True)
        r = jnp.dot(a.astype(jnp.bfloat16), g_ref[...],
                    preferred_element_type=jnp.float32)              # (TN, Dp)

        # Single fused gate matmul: [r, h] (TN, 2*Dp) @ W_rh (2*Dp, 4*Dp).
        x = jnp.concatenate([r.astype(jnp.bfloat16), h_bf], axis=1)
        pre = gate_f + jnp.dot(x, wrh_ref[...],
                               preferred_element_type=jnp.float32)   # (TN, 4*Dp)

        # Lane-aligned static gate slices (offsets are multiples of 128).
        i_g = jax.nn.sigmoid(pre[:, 0 * Dp:1 * Dp])
        f_g = jax.nn.sigmoid(pre[:, 1 * Dp:2 * Dp])
        g_g = jnp.tanh(pre[:, 2 * Dp:3 * Dp])
        o_g = jax.nn.sigmoid(pre[:, 3 * Dp:4 * Dp])

        c_new = f_g * c + i_g * g_g
        h_new = o_g * jnp.tanh(c_new) + f       # residual f, as in PyTorch forward
        return h_new, c_new

    h, _ = lax.fori_loop(0, K, step, (f, jnp.zeros_like(f)), unroll=1)
    out_ref[...] = h.astype(out_ref.dtype)


def fully_contextual_embedding(f, G, W_ih, W_hh, b_ih, b_hh):
    """Pallas-TPU forward of FullyContextualEmbedding.

    f: (N, D), G: (K, D), W_ih: (4D, 2D), W_hh: (4D, D), b_ih/b_hh: (4D,).
    Returns h: (N, D).
    """
    N, D = f.shape
    K = G.shape[0]
    D_pad = _round_up(D, 128)

    # Row tiling: big tiles for MXU/EUP utilisation, >= 2 programs when N > 128
    # (v7x has 2 TensorCores), tiny single tile for tiny N.
    if N <= 128:
        TILE_N = _round_up(N, 8)
    elif N >= 1024:
        TILE_N = 512
    elif N >= 512:
        TILE_N = 256
    else:
        TILE_N = 128
    # Keep the (TILE_N, 4*D_pad) f32 pre-activation value under ~8 MiB.
    while TILE_N > 128 and TILE_N * 4 * D_pad * 4 > (8 << 20):
        TILE_N //= 2
    N_pad = _round_up(N, TILE_N)

    f32, bf16 = jnp.float32, jnp.bfloat16
    W_ih = W_ih.astype(f32)
    W_hh = W_hh.astype(f32)
    bias = (b_ih.astype(f32) + b_hh.astype(f32))

    # Pack per-gate weights (PyTorch LSTMCell gate order i, f, g, o) into wide
    # lane-aligned slabs of shape (in, 4*D_pad): gate g occupies output lanes
    # [g*D_pad, (g+1)*D_pad).  All transposes happen here in plain XLA.
    def gate_slab(W):                              # W: (4D, D) [out-major]
        Wg = W.reshape(4, D, D)                    # (gate, out, in)
        WgT = jnp.transpose(Wg, (0, 2, 1))         # (gate, in, out)
        WgT = jnp.pad(WgT, ((0, 0), (0, D_pad - D), (0, D_pad - D)))
        return jnp.transpose(WgT, (1, 0, 2)).reshape(D_pad, 4 * D_pad)

    Wf_all = gate_slab(W_ih[:, :D]).astype(bf16)               # f-half of W_ih
    Wr_all = gate_slab(W_ih[:, D:])                            # r-half of W_ih
    Wh_all = gate_slab(W_hh)                                    # hidden weights
    Wrh_all = jnp.concatenate([Wr_all, Wh_all], axis=0).astype(bf16)  # (2Dp, 4Dp)
    b_all = jnp.pad(bias.reshape(4, D),
                    ((0, 0), (0, D_pad - D))).reshape(1, 4 * D_pad)   # f32

    f_p = jnp.pad(f, ((0, N_pad - N), (0, D_pad - D)))
    G_p = jnp.pad(G.astype(f32), ((0, 0), (0, D_pad - D))).astype(bf16)  # (K, Dp)
    GT_p = jnp.transpose(G_p)                                            # (Dp, K)

    grid = (N_pad // TILE_N,)
    row_spec = pl.BlockSpec((TILE_N, D_pad), lambda i: (i, 0))

    def resident(shape):
        nd = len(shape)
        return pl.BlockSpec(shape, lambda i, _nd=nd: (0,) * _nd)

    in_specs = [
        row_spec,                                   # f (tiled on N)
        resident((K, D_pad)),                       # G       (bf16, resident)
        resident((D_pad, K)),                       # G^T     (bf16, resident)
        resident((D_pad, 4 * D_pad)),               # Wf_all  (bf16, resident)
        resident((2 * D_pad, 4 * D_pad)),           # Wrh_all (bf16, resident)
        resident((1, 4 * D_pad)),                   # bias    (f32,  resident)
    ]

    # Explicit VMEM budget derived from the actual slab / tile sizes,
    # capped at 64 MiB so it is safe on v7x as well as v5e/v6e.
    nbytes = lambda x: int(x.size) * x.dtype.itemsize
    resident_bytes = (nbytes(G_p) + nbytes(GT_p) + nbytes(Wf_all)
                      + nbytes(Wrh_all) + nbytes(b_all))
    tile_bytes = 2 * 2 * TILE_N * D_pad * jnp.dtype(f.dtype).itemsize
    value_bytes = TILE_N * (2 * 4 * D_pad + 2 * 2 * D_pad + 4 * D_pad) * 4
    vmem_limit = int(min(max(2 * resident_bytes + tile_bytes + 2 * value_bytes,
                             32 << 20), 64 << 20))

    # Advisory cost estimate (after the f@W_f hoist and gate fusion).
    flops = int(8 * N_pad * D_pad * D_pad
                + K * (4 * N_pad * K * D_pad
                       + 16 * N_pad * D_pad * D_pad
                       + 10 * N_pad * D_pad))
    transcendentals = int(K * N_pad * (K + 5 * D_pad + 1))
    bytes_accessed = int(nbytes(f_p) + resident_bytes
                         + N_pad * D_pad * jnp.dtype(f.dtype).itemsize)

    out_p = pl.pallas_call(
        fce_kernel,
        out_shape=jax.ShapeDtypeStruct((N_pad, D_pad), f.dtype),
        grid_spec=pltpu.PrefetchScalarGridSpec(
            num_scalar_prefetch=0,
            grid=grid,
            in_specs=in_specs,
            out_specs=row_spec,
        ),
        compiler_params=pltpu.CompilerParams(
            dimension_semantics=("parallel",),
            vmem_limit_bytes=vmem_limit),
        cost_estimate=pl.CostEstimate(
            flops=flops,
            transcendentals=transcendentals,
            bytes_accessed=bytes_accessed),
    )(f_p, G_p, GT_p, Wf_all, Wrh_all, b_all)

    return out_p[:N, :D]


def fce_reference(f, G, W_ih, W_hh, b_ih, b_hh):
    """Pure-JAX f32 reference mirroring the PyTorch module."""
    D = f.shape[1]
    h = f
    c = jnp.zeros_like(f)
    for _ in range(G.shape[0]):
        a = jax.nn.softmax(h @ G.T, axis=1)
        r = a @ G
        x = jnp.concatenate([f, r], axis=1)
        gates = x @ W_ih.T + b_ih + h @ W_hh.T + b_hh
        i_g = jax.nn.sigmoid(gates[:, 0 * D:1 * D])
        f_g = jax.nn.sigmoid(gates[:, 1 * D:2 * D])
        g_g = jnp.tanh(gates[:, 2 * D:3 * D])
        o_g = jax.nn.sigmoid(gates[:, 3 * D:4 * D])
        c = f_g * c + i_g * g_g
        h = o_g * jnp.tanh(c) + f
    return h


if __name__ == "__main__":
    # Small shapes consistent with the module: N query rows, K support rows,
    # feat_dim D.  LSTMCell(input=2D, hidden=D).
    N, K, D = 8, 8, 32

    key = jax.random.PRNGKey(0)
    kf, kg, k1, k2, k3, k4 = jax.random.split(key, 6)

    f = jax.random.normal(kf, (N, D), dtype=jnp.float32)
    G = jax.random.normal(kg, (K, D), dtype=jnp.float32)

    # PyTorch-style LSTMCell init: uniform(-1/sqrt(D), 1/sqrt(D)).
    bound = 1.0 / (D ** 0.5)
    W_ih = jax.random.uniform(k1, (4 * D, 2 * D), jnp.float32, -bound, bound)
    W_hh = jax.random.uniform(k2, (4 * D, D), jnp.float32, -bound, bound)
    b_ih = jax.random.uniform(k3, (4 * D,), jnp.float32, -bound, bound)
    b_hh = jax.random.uniform(k4, (4 * D,), jnp.float32, -bound, bound)

    out = fully_contextual_embedding(f, G, W_ih, W_hh, b_ih, b_hh)
    out = jax.block_until_ready(out)

    ref = fce_reference(f, G, W_ih, W_hh, b_ih, b_hh)
    assert out.shape == (N, D)
    # bf16 MXU operands (f32 accumulation) + approx-reciprocal softmax over a
    # K-step recurrence -> relaxed tolerance vs the exact-f32 reference.
    assert jnp.allclose(out, ref, atol=1e-1, rtol=1e-1), "mismatch vs reference"

    print("KERNEL_OK")
</pallas_src>

<mosaic_0001>
module attributes {stable_mosaic.version = 11 : i64} {
  func.func @fce_kernel(%arg0: i32, %arg1: memref<8x128xf32, #tpu.memory_space<vmem>>, %arg2: memref<8x128xbf16, #tpu.memory_space<vmem>>, %arg3: memref<128x8xbf16, #tpu.memory_space<vmem>>, %arg4: memref<128x512xbf16, #tpu.memory_space<vmem>>, %arg5: memref<256x512xbf16, #tpu.memory_space<vmem>>, %arg6: memref<1x512xf32, #tpu.memory_space<vmem>>, %arg7: memref<8x128xf32, #tpu.memory_space<vmem>>) attributes {dimension_semantics = [#tpu.dimension_semantics<parallel>], iteration_bounds = array<i64: 1>, scalar_prefetch = 0 : i64, scratch_operands = 0 : i64, tpu.core_type = #tpu.core_type<tc>, window_params = [{transform_indices = @transform_0, window_bounds = array<i64: 8, 128>}, {pipeline_mode = #tpu.pipeline_mode<synchronous>, transform_indices = @transform_1, window_bounds = array<i64: 8, 128>}, {pipeline_mode = #tpu.pipeline_mode<synchronous>, transform_indices = @transform_2, window_bounds = array<i64: 128, 8>}, {pipeline_mode = #tpu.pipeline_mode<synchronous>, transform_indices = @transform_3, window_bounds = array<i64: 128, 512>}, {pipeline_mode = #tpu.pipeline_mode<synchronous>, transform_indices = @transform_4, window_bounds = array<i64: 256, 512>}, {pipeline_mode = #tpu.pipeline_mode<synchronous>, transform_indices = @transform_5, window_bounds = array<i64: 1, 512>}, {transform_indices = @transform_6, window_bounds = array<i64: 8, 128>}]} {
    %c0 = arith.constant 0 : index
    %c0_0 = arith.constant 0 : index
    %0 = vector.load %arg1[%c0, %c0_0] : memref<8x128xf32, #tpu.memory_space<vmem>>, vector<8x128xf32>
    %1 = arith.truncf %0 : vector<8x128xf32> to vector<8x128xbf16>
    %c0_1 = arith.constant 0 : index
    %c0_2 = arith.constant 0 : index
    %2 = vector.load %arg4[%c0_1, %c0_2] : memref<128x512xbf16, #tpu.memory_space<vmem>>, vector<128x512xbf16>
    %cst = arith.constant dense<0.000000e+00> : vector<8x512xf32>
    %3 = tpu.matmul %1, %2, %cst {dimension_numbers = #tpu.dot_dimension_numbers<[1], [0], [0], [1], [0, 0, 1, 1], [], []>} : vector<8x128xbf16>, vector<128x512xbf16>, vector<8x512xf32> -> vector<8x512xf32>
    %c0_3 = arith.constant 0 : index
    %c0_4 = arith.constant 0 : index
    %4 = vector.load %arg6[%c0_3, %c0_4] : memref<1x512xf32, #tpu.memory_space<vmem>>, vector<1x512xf32>
    %5 = vector.broadcast %4 : vector<1x512xf32> to vector<8x512xf32>
    %6 = arith.addf %3, %5 : vector<8x512xf32>
    %cst_5 = arith.constant 0.000000e+00 : f32
    %7 = vector.broadcast %cst_5 : f32 to vector<8x128xf32>
    %c0_i32 = arith.constant 0 : i32
    %c8_i32 = arith.constant 8 : i32
    %8 = arith.addi %c0_i32, %c8_i32 : i32
    %c1_i32 = arith.constant 1 : i32
    %9:2 = scf.for %arg8 = %c0_i32 to %8 step %c1_i32 iter_args(%arg9 = %0, %arg10 = %7) -> (vector<8x128xf32>, vector<8x128xf32>)  : i32 {
      %11 = arith.truncf %arg9 : vector<8x128xf32> to vector<8x128xbf16>
      %c0_8 = arith.constant 0 : index
      %c0_9 = arith.constant 0 : index
      %12 = vector.load %arg3[%c0_8, %c0_9] : memref<128x8xbf16, #tpu.memory_space<vmem>>, vector<128x8xbf16>
      %cst_10 = arith.constant dense<0.000000e+00> : vector<8x8xf32>
      %13 = tpu.matmul %11, %12, %cst_10 {dimension_numbers = #tpu.dot_dimension_numbers<[1], [0], [0], [1], [0, 0, 1, 1], [], []>} : vector<8x128xbf16>, vector<128x8xbf16>, vector<8x8xf32> -> vector<8x8xf32>
      %cst_11 = arith.constant dense<0xFF800000> : vector<8xf32>
      %14 = vector.multi_reduction <maximumf>, %13, %cst_11 [1] : vector<8x8xf32> to vector<8xf32>
      %15 = vector.shape_cast %14 : vector<8xf32> to vector<8x1xf32>
      %16 = vector.broadcast %15 : vector<8x1xf32> to vector<8x8xf32>
      %17 = arith.subf %13, %16 : vector<8x8xf32>
      %18 = math.exp %17 : vector<8x8xf32>
      %cst_12 = arith.constant dense<0.000000e+00> : vector<8xf32>
      %19 = vector.multi_reduction <add>, %18, %cst_12 [1] : vector<8x8xf32> to vector<8xf32>
      %20 = vector.shape_cast %19 : vector<8xf32> to vector<8x1xf32>
      %21 = tpu.reciprocal %20 {approx = true} : vector<8x1xf32> -> vector<8x1xf32>
      %22 = vector.broadcast %21 : vector<8x1xf32> to vector<8x8xf32>
      %23 = arith.mulf %18, %22 : vector<8x8xf32>
      %24 = arith.truncf %23 : vector<8x8xf32> to vector<8x8xbf16>
      %c0_13 = arith.constant 0 : index
      %c0_14 = arith.constant 0 : index
      %25 = vector.load %arg2[%c0_13, %c0_14] : memref<8x128xbf16, #tpu.memory_space<vmem>>, vector<8x128xbf16>
      %cst_15 = arith.constant dense<0.000000e+00> : vector<8x128xf32>
      %26 = tpu.matmul %24, %25, %cst_15 {dimension_numbers = #tpu.dot_dimension_numbers<[1], [0], [0], [1], [0, 0, 1, 1], [], []>} : vector<8x8xbf16>, vector<8x128xbf16>, vector<8x128xf32> -> vector<8x128xf32>
      %27 = arith.truncf %26 : vector<8x128xf32> to vector<8x128xbf16>
      %28 = tpu.concatenate %27, %11 in 1 : vector<8x128xbf16>, vector<8x128xbf16> -> vector<8x256xbf16>
      %c0_16 = arith.constant 0 : index
      %c0_17 = arith.constant 0 : index
      %29 = vector.load %arg5[%c0_16, %c0_17] : memref<256x512xbf16, #tpu.memory_space<vmem>>, vector<256x512xbf16>
      %cst_18 = arith.constant dense<0.000000e+00> : vector<8x512xf32>
      %30 = tpu.matmul %28, %29, %cst_18 {dimension_numbers = #tpu.dot_dimension_numbers<[1], [0], [0], [1], [0, 0, 1, 1], [], []>} : vector<8x256xbf16>, vector<256x512xbf16>, vector<8x512xf32> -> vector<8x512xf32>
      %31 = arith.addf %6, %30 : vector<8x512xf32>
      %32 = vector.extract_strided_slice %31 {offsets = [0, 0], sizes = [8, 128], strides = [1, 1]} : vector<8x512xf32> to vector<8x128xf32>
      %33 = arith.negf %32 : vector<8x128xf32>
      %34 = math.exp %33 : vector<8x128xf32>
      %cst_19 = arith.constant 1.000000e+00 : f32
      %35 = vector.broadcast %cst_19 : f32 to vector<8x128xf32>
      %36 = arith.addf %35, %34 : vector<8x128xf32>
      %37 = arith.divf %35, %36 : vector<8x128xf32>
      %38 = vector.extract_strided_slice %31 {offsets = [0, 128], sizes = [8, 128], strides = [1, 1]} : vector<8x512xf32> to vector<8x128xf32>
      %39 = arith.negf %38 : vector<8x128xf32>
      %40 = math.exp %39 : vector<8x128xf32>
      %cst_20 = arith.constant 1.000000e+00 : f32
      %41 = vector.broadcast %cst_20 : f32 to vector<8x128xf32>
      %42 = arith.addf %41, %40 : vector<8x128xf32>
      %43 = arith.divf %41, %42 : vector<8x128xf32>
      %44 = vector.extract_strided_slice %31 {offsets = [0, 256], sizes = [8, 128], strides = [1, 1]} : vector<8x512xf32> to vector<8x128xf32>
      %45 = math.tanh %44 : vector<8x128xf32>
      %46 = vector.extract_strided_slice %31 {offsets = [0, 384], sizes = [8, 128], strides = [1, 1]} : vector<8x512xf32> to vector<8x128xf32>
      %47 = arith.negf %46 : vector<8x128xf32>
      %48 = math.exp %47 : vector<8x128xf32>
      %cst_21 = arith.constant 1.000000e+00 : f32
      %49 = vector.broadcast %cst_21 : f32 to vector<8x128xf32>
      %50 = arith.addf %49, %48 : vector<8x128xf32>
      %51 = arith.divf %49, %50 : vector<8x128xf32>
      %52 = arith.mulf %43, %arg10 : vector<8x128xf32>
      %53 = arith.mulf %37, %45 : vector<8x128xf32>
      %54 = arith.addf %52, %53 : vector<8x128xf32>
      %55 = math.tanh %54 : vector<8x128xf32>
      %56 = arith.mulf %51, %55 : vector<8x128xf32>
      %57 = arith.addf %56, %0 : vector<8x128xf32>
      scf.yield %57, %54 : vector<8x128xf32>, vector<8x128xf32>
    }
    %c0_6 = arith.constant 0 : index
    %c0_7 = arith.constant 0 : index
    %10 = vector.load %arg7[%c0_6, %c0_7] : memref<8x128xf32, #tpu.memory_space<vmem>>, vector<8x128xf32>
    tpu.vector_store %arg7[%c0_6, %c0_7], %9#0 {strides = array<i32>} : memref<8x128xf32, #tpu.memory_space<vmem>>, vector<8x128xf32>,
    return
  }
  func.func @transform_0(%arg0: i32) -> (i32, i32) {
    %c0_i32 = arith.constant 0 : i32
    %c0_i32_0 = arith.constant 0 : i32
    return %arg0, %c0_i32 : i32, i32
  }
  func.func @transform_1(%arg0: i32) -> (i32, i32) {
    %c0_i32 = arith.constant 0 : i32
    %c0_i32_0 = arith.constant 0 : i32
    %c0_i32_1 = arith.constant 0 : i32
    return %c0_i32, %c0_i32_0 : i32, i32
  }
  func.func @transform_2(%arg0: i32) -> (i32, i32) {
    %c0_i32 = arith.constant 0 : i32
    %c0_i32_0 = arith.constant 0 : i32
    %c0_i32_1 = arith.constant 0 : i32
    return %c0_i32, %c0_i32_0 : i32, i32
  }
  func.func @transform_3(%arg0: i32) -> (i32, i32) {
    %c0_i32 = arith.constant 0 : i32
    %c0_i32_0 = arith.constant 0 : i32
    %c0_i32_1 = arith.constant 0 : i32
    return %c0_i32, %c0_i32_0 : i32, i32
  }
  func.func @transform_4(%arg0: i32) -> (i32, i32) {
    %c0_i32 = arith.constant 0 : i32
    %c0_i32_0 = arith.constant 0 : i32
    %c0_i32_1 = arith.constant 0 : i32
    return %c0_i32, %c0_i32_0 : i32, i32
  }
  func.func @transform_5(%arg0: i32) -> (i32, i32) {
    %c0_i32 = arith.constant 0 : i32
    %c0_i32_0 = arith.constant 0 : i32
    %c0_i32_1 = arith.constant 0 : i32
    return %c0_i32, %c0_i32_0 : i32, i32
  }
  func.func @transform_6(%arg0: i32) -> (i32, i32) {
    %c0_i32 = arith.constant 0 : i32
    %c0_i32_0 = arith.constant 0 : i32
    return %arg0, %c0_i32 : i32, i32
  }
}

</mosaic_0001>

<bundles_post_ra>
// kernel: tpu_custom_call.1
= control target key start
LH: loop header
LB: loop body
LE: loop exit
PB: predicated region body
PF: predicated region fallthrough
CT: control target
= control target key end

     0   :  { %11 = vsyncpa [#allocation3], 0  ;;  %s1657_s0 = inlined_call_operand.vmem [shape: f32[8,128], index: 0, kind: input, shape index: {}]   ;;  %s1658_s1 = inlined_call_operand.vmem [shape: bf16[8,128], index: 1, kind: input, shape index: {}]   ;;  %s1659_s2 = inlined_call_operand.vmem [shape: bf16[128,8], index: 2, kind: input, shape index: {}]   ;;  %s1660_s3 = inlined_call_operand.hbm [shape: bf16[128,512], index: 3, kind: input, shape index: {}]   ;;  %s1661_s4 = inlined_call_operand.hbm [shape: bf16[256,512], index: 4, kind: input, shape index: {}]   ;;  %s1662_s5 = inlined_call_operand.vmem [shape: f32[1,512], index: 5, kind: input, shape index: {}]   ;;  %s1663_s6 = inlined_call_operand.hbm [shape: f32[8,128], index: 6, kind: output, shape index: {}]  }
   0x1   :  { %12 = vsyncpa [#allocation6], 0 }
   0x2   :  { %13 = vsyncpa [#allocation4], 0  ;;  %s1494_s21 = smov [#allocation2]   ;;  %s1398_s25 = scalar_lea.hbm %s1660_s3, 4096 }
   0x3   :  { %s25_s22 = sshll.u32 %s1494_s21, 4  ;;  %p1399_p0 = scmp.ne.s32.totalorder %s1660_s3, %s1398_s25  ;;  %s26_s22 = int_to_ptr.vmem [resolvable:$true] %s25_s22 }
   0x4   :  { %p1402_p1 = scmp.lt.u32.totalorder %s1398_s25, %s1660_s3 }
   0x6   :  { %p1404_p2 = pnand %p1402_p1, %p1399_p0 }
   0x8   :  { %1407 = shalt.err (!%p1404_p2)
}
   0x9   :  { %s1408_s30 = scalar_lea.vmem %s26_s22, 4096  ;;  %p1413_p4 = scmp.lt.s32.totalorder %s26_s22, %s26_s22 }
   0xa   :  { %p1409_p3 = scmp.ne.s32.totalorder %s26_s22, %s1408_s30  ;;  %p1414_p5 = scmp.lt.s32.totalorder %s1408_s30, %s1408_s30 }
   0xc   :  { %p1415_p6 = por %p1414_p5, %p1413_p4 }
   0xe   :  { %p1416_p7 = pnand %p1415_p6, %p1409_p3 }
  0x10   :  { %1419 = shalt.err (!%p1416_p7)
}
  0x11   :  { %s1495_s7 = smov 256   ;;  %s1496_s8 = smov 16  }
  0x12   :  { %31 = dma.hbm_to_vmem [thread:$0]  %s1660_s3, 4096, %s26_s22, [#allocation3], %s1495_s7, %s1495_s7, %s1496_s8  }
  0x13   :  { %s1497_s11 = smov [#allocation5]   ;;  %s1420_s15 = scalar_lea.hbm %s1661_s4, 8192 }
  0x14   :  { %s37_s12 = sshll.u32 %s1497_s11, 4  ;;  %p1421_p8 = scmp.ne.s32.totalorder %s1661_s4, %s1420_s15  ;;  %s38_s12 = int_to_ptr.vmem [resolvable:$true] %s37_s12 }
  0x15   :  { %p1424_p9 = scmp.lt.u32.totalorder %s1420_s15, %s1661_s4 }
  0x17   :  { %p1426_p10 = pnand %p1424_p9, %p1421_p8 }
  0x19   :  { %1429 = shalt.err (!%p1426_p10)
}
  0x1a   :  { %s1430_s20 = scalar_lea.vmem %s38_s12, 8192  ;;  %p1435_p12 = scmp.lt.s32.totalorder %s38_s12, %s38_s12 }
  0x1b   :  { %p1431_p11 = scmp.ne.s32.totalorder %s38_s12, %s1430_s20  ;;  %p1436_p13 = scmp.lt.s32.totalorder %s1430_s20, %s1430_s20 }
  0x1d   :  { %p1437_p0 = por %p1436_p13, %p1435_p12 }
  0x1f   :  { %p1438_p1 = pnand %p1437_p0, %p1431_p11 }
  0x21   :  { %1441 = shalt.err (!%p1438_p1)
}
  0x22   :  { %43 = dma.hbm_to_vmem [thread:$0]  %s1661_s4, 8192, %s38_s12, [#allocation6], %s1495_s7, %s1495_s7, %s1496_s8  }
  0x23   :  { %1476 = dma.done.wait [#allocation3], 4096  }
  0x24   :  { %1477 = vsyncadd [#allocation3], 4294963200 }
  0x25   :  { %1478 = dma.done.wait [#allocation6], 8192  }
  0x26   :  { %1479 = vsyncadd [#allocation6], 4294959104  ;;  %v1498_v0 = vmov 0   ;;  %v1226_v1 = vld [vmem:[#allocation2 + $0x4] ss:$16 sps:$4 sm:$0xff]   ;;  %v89_v35 = vlaneseq  ;;  %v1579_v58 = vmov 0.0  }
  0x27   :  { %301 = vmatprep.mubr.bf16.mxu0 %v1498_v0  ;;  %342 = vmatprep.mubr.bf16.mxu1 %v1498_v0  ;;  %v1228_v2 = vld [vmem:[#allocation2 + $0xc] ss:$16 sps:$4 sm:$0xff]   ;;  %v1230_v3 = vld [vmem:[#allocation2] ss:$16 sps:$4 sm:$0xff]   ;;  %v1231_v4 = vld [vmem:[#allocation2 + $0x8] ss:$16 sps:$4 sm:$0xff]  }
  0x28   :  { %269 = vmatprep.subr.bf16.mxu0 %v1226_v1  ;;  %310 = vmatprep.subr.bf16.mxu1 %v1228_v2  ;;  %v1232_v5 = vld [vmem:[#allocation2 + $0x24] ss:$16 sps:$4 sm:$0xff]   ;;  %v1234_v6 = vld [vmem:[#allocation2 + $0x2c] ss:$16 sps:$4 sm:$0xff]   ;;  %v1236_v7 = vld [vmem:[#allocation2 + $0x20] ss:$16 sps:$4 sm:$0xff]  }
  0x29   :  { %270 = vmatpush1.bf16.msra.mxu0 %v1230_v3  ;;  %311 = vmatpush1.bf16.msra.mxu1 %v1231_v4  ;;  %v1237_v8 = vld [vmem:[#allocation2 + $0x28] ss:$16 sps:$4 sm:$0xff]   ;;  %v1238_v9 = vld [vmem:[#allocation2 + $0x44] ss:$16 sps:$4 sm:$0xff]   ;;  %v1240_v10 = vld [vmem:[#allocation2 + $0x4c] ss:$16 sps:$4 sm:$0xff]  }
  0x2a   :  { %271 = vmatprep.subr.bf16.mxu0 %v1232_v5  ;;  %312 = vmatprep.subr.bf16.mxu1 %v1234_v6  ;;  %v1242_v11 = vld [vmem:[#allocation2 + $0x40] ss:$16 sps:$4 sm:$0xff]   ;;  %v1243_v12 = vld [vmem:[#allocation2 + $0x48] ss:$16 sps:$4 sm:$0xff]   ;;  %v1244_v13 = vld [vmem:[#allocation2 + $0x64] ss:$16 sps:$4 sm:$0xff]  }
  0x2b   :  { %v1246_v14 = vld [vmem:[#allocation2 + $0x6c] ss:$16 sps:$4 sm:$0xff]   ;;  %v1248_v15 = vld [vmem:[#allocation2 + $0x60] ss:$16 sps:$4 sm:$0xff]   ;;  %v1249_v16 = vld [vmem:[#allocation2 + $0x68] ss:$16 sps:$4 sm:$0xff]  }
  0x2c   :  { %v1250_v17 = vld [vmem:[#allocation2 + $0x84] ss:$16 sps:$4 sm:$0xff]   ;;  %v1252_v18 = vld [vmem:[#allocation2 + $0x8c] ss:$16 sps:$4 sm:$0xff]   ;;  %v1254_v19 = vld [vmem:[#allocation2 + $0x80] ss:$16 sps:$4 sm:$0xff]  }
  0x2d   :  { %272 = vmatpush1.bf16.msra.mxu0 %v1236_v7  ;;  %313 = vmatpush1.bf16.msra.mxu1 %v1237_v8  ;;  %v1255_v20 = vld [vmem:[#allocation2 + $0x88] ss:$16 sps:$4 sm:$0xff]   ;;  %v1256_v21 = vld [vmem:[#allocation2 + $0xa4] ss:$16 sps:$4 sm:$0xff]   ;;  %v1258_v22 = vld [vmem:[#allocation2 + $0xac] ss:$16 sps:$4 sm:$0xff]  }
  0x2e   :  { %273 = vmatprep.subr.bf16.mxu0 %v1238_v9  ;;  %314 = vmatprep.subr.bf16.mxu1 %v1240_v10  ;;  %v1260_v23 = vld [vmem:[#allocation2 + $0xa0] ss:$16 sps:$4 sm:$0xff]   ;;  %v1261_v24 = vld [vmem:[#allocation2 + $0xa8] ss:$16 sps:$4 sm:$0xff]   ;;  %v1262_v25 = vld [vmem:[#allocation2 + $0xc4] ss:$16 sps:$4 sm:$0xff]  }
  0x2f   :  { %v1264_v26 = vld [vmem:[#allocation2 + $0xcc] ss:$16 sps:$4 sm:$0xff]   ;;  %v1266_v27 = vld [vmem:[#allocation2 + $0xc0] ss:$16 sps:$4 sm:$0xff]   ;;  %v1267_v28 = vld [vmem:[#allocation2 + $0xc8] ss:$16 sps:$4 sm:$0xff]  }
  0x30   :  { %v1268_v29 = vld [vmem:[#allocation2 + $0xe4] ss:$16 sps:$4 sm:$0xff]   ;;  %v1270_v30 = vld [vmem:[#allocation2 + $0xec] ss:$16 sps:$4 sm:$0xff]   ;;  %v1272_v31 = vld [vmem:[#allocation2 + $0xe0] ss:$16 sps:$4 sm:$0xff]  }
  0x31   :  { %274 = vmatpush1.bf16.msra.mxu0 %v1242_v11  ;;  %315 = vmatpush1.bf16.msra.mxu1 %v1243_v12  ;;  %v1273_v32 = vld [vmem:[#allocation2 + $0xe8] ss:$16 sps:$4 sm:$0xff]   ;;  %v1564_v33 = vld [vmem:[%s1657_s0] sm:$0xff]   ;;  %v90_v36 = vshrl.u32 %v89_v35, 7  ;;  %s1584_s0 = smov 0  }
  0x32   :  { %275 = vmatprep.subr.bf16.mxu0 %v1244_v13  ;;  %316 = vmatprep.subr.bf16.mxu1 %v1246_v14  ;;  %v54_v34 = vpack.c.bf16 %v1564_v33, %v1564_v33  ;;  %v87_v39 = vld [vmem:[%s1662_s5] sm:$0xf]  ;;  %v1664_v59 = vmov %v1564_v33 }
  0x33   :  { %v91_v37 = vsub.s32 0, %v90_v36  ;;  %v99_v38 = vsub.s32 2, %v90_v36  ;;  %v95_v40 = vsub.s32 1, %v90_v36  ;;  %v103_v41 = vsub.s32 3, %v90_v36 }
  0x35   :  { %276 = vmatpush1.bf16.msra.mxu0 %v1248_v15  ;;  %317 = vmatpush1.bf16.msra.mxu1 %v1249_v16  ;;  %v92_v42 = vrot.slane %v87_v39, %v91_v37  ;;  %v100_v43 = vrot.slane %v87_v39, %v99_v38  ;;  %v96_v44 = vrot.slane %v87_v39, %v95_v40 }
  0x36   :  { %277 = vmatprep.subr.bf16.mxu0 %v1250_v17  ;;  %318 = vmatprep.subr.bf16.mxu1 %v1252_v18  ;;  %v104_v45 = vrot.slane %v87_v39, %v103_v41 }
  0x39   :  { %278 = vmatpush1.bf16.msra.mxu0 %v1254_v19  ;;  %319 = vmatpush1.bf16.msra.mxu1 %v1255_v20 }
  0x3a   :  { %279 = vmatprep.subr.bf16.mxu0 %v1256_v21  ;;  %320 = vmatprep.subr.bf16.mxu1 %v1258_v22 }
  0x3d   :  { %280 = vmatpush1.bf16.msra.mxu0 %v1260_v23  ;;  %321 = vmatpush1.bf16.msra.mxu1 %v1261_v24 }
  0x3e   :  { %281 = vmatprep.subr.bf16.mxu0 %v1262_v25  ;;  %322 = vmatprep.subr.bf16.mxu1 %v1264_v26 }
  0x41   :  { %282 = vmatpush1.bf16.msra.mxu0 %v1266_v27  ;;  %323 = vmatpush1.bf16.msra.mxu1 %v1267_v28 }
  0x42   :  { %283 = vmatprep.subr.bf16.mxu0 %v1268_v29  ;;  %324 = vmatprep.subr.bf16.mxu1 %v1270_v30 }
  0x45   :  { %284 = vmatpush1.bf16.msra.mxu0 %v1272_v31  ;;  %325 = vmatpush1.bf16.msra.mxu1 %v1273_v32 }
  0x48   :  { %302 = vmatmul.mubr.bf16.vlgmr.msra.gmra.mrb[0].mxu0 %v54_v34  ;;  %343 = vmatmul.mubr.bf16.vlgmr.msra.gmra.mrb[0].mxu1 %v54_v34 }
 0x11b   :  { %v303_v46 = vpop.f32.mrb[0].mxu0  ;;  %v344_v47 = vpop.f32.mrb[0].mxu1 }
 0x11c   :  { %v1571_v48 = vadd.f32 %v303_v46, %v92_v42  ;;  %v1573_v49 = vadd.f32 %v344_v47, %v100_v43  ;;  %v305_v50 = vpop.f32.mrb[1].mxu0  ;;  %v346_v51 = vpop.f32.mrb[1].mxu1 }
 0x11d   :  { %v1575_v52 = vadd.f32 %v305_v50, %v96_v44  ;;  %v1577_v53 = vadd.f32 %v346_v51, %v104_v45  ;;  %v307_v54 = vpop.f32.mrb[2].mxu0  ;;  %v348_v55 = vpop.f32.mrb[2].mxu1 }
 0x11e   :  { %v308_v56 = vpop.f32.mrb[3].mxu0  ;;  %v349_v57 = vpop.f32.mrb[3].mxu1 }
 0x11f LB: > { %v1274_v60 = vld [vmem:[%s1659_s2] sm:$0xff]   ;;  %v1499_v61 = vmov 0.0   ;;  %v1275_v62 = vld [vmem:[%s1659_s2 + $0x8] sm:$0xff]   ;;  %vm1500_vm0 = vmmov 0   ;;  %v1276_v63 = vld [vmem:[%s1659_s2 + $0x10] sm:$0xff]   ;;  %v1617_v5 = vpack.c.bf16 %v1488_v59, %v1488_v59  ;;  %vm464_vm1 = vcmask 64512   ;;  %s1492_s0 = sphi %s1584_s0, %s356_s0   ;;  %v1488_v59 = vphi %v1664_v59, %v1665_v59   ;;  %v1484_v58 = vphi %v1579_v58, %v1017_v58  }
 0x120   : > { %1168 = vmatprep.subr.bf16.mxu0 %v1499_v61  ;;  %1188 = vmatprep.subr.bf16.mxu1 %v1499_v61  ;;  %v1277_v0 = vld [vmem:[%s1659_s2 + $0x18] sm:$0xff]   ;;  %v1278_v1 = vld [vmem:[%s1659_s2 + $0x20] sm:$0xff]   ;;  %v1279_v2 = vld [vmem:[%s1659_s2 + $0x28] sm:$0xff]   ;;  %vm481_vm2 = vcmask 1043456   ;;  %s356_s0 = sadd.s32 1, %s1492_s0  }
 0x121   : > { %1169 = vmatpush3.bf16.msra.mxu0 %v1274_v60  ;;  %1184 = vmatprep.mubr.msk.bf16.mxu0 %vm1500_vm0, %v1499_v61  ;;  %v1280_v3 = vld [vmem:[%s1659_s2 + $0x30] sm:$0xff]   ;;  %v1281_v4 = vld [vmem:[%s1659_s2 + $0x38] sm:$0xff]   ;;  %v477_v16 = vld [vmem:[%s1658_s1] sm:$0xf]  ;;  %p353_p2 = scmp.ge.s32.totalorder %s356_s0, 8  }
 0x122   : > { %1170 = vmatprep.subr.bf16.mxu0 %v1499_v61  ;;  %1190 = vmatprep.mubr.msk.bf16.mxu1 %vm1500_vm0, %v1499_v61  ;;  %v483_v17 = vsel %vm481_vm2, %v477_v16, 0  ;;  %v1284_v18 = vld [vmem:[#allocation5 + $0x4] ss:$16 sps:$4 sm:$0xff]   ;;  %v1285_v19 = vld [vmem:[#allocation5 + $0x8] ss:$16 sps:$4 sm:$0xff]   ;;  %s1501_s18 = smov (%p353_p2), [#allocation7]  }
 0x123   : > { %1189 = vmatpush3.bf16.msra.mxu1 %v483_v17  ;;  %v1287_v20 = vld [vmem:[#allocation5 + $0xc] ss:$16 sps:$4 sm:$0xff]   ;;  %v1291_v22 = vld [vmem:[#allocation5 + $0x28] ss:$16 sps:$4 sm:$0xff]   ;;  %v1282_v60 = vld [vmem:[#allocation5] ss:$16 sps:$4 sm:$0xff]  }
 0x124   : > { %910 = vmatprep.subr.bf16.mxu1 %v1284_v18  ;;  %v1293_v21 = vld [vmem:[#allocation5 + $0x2c] ss:$16 sps:$4 sm:$0xff]   ;;  %v1297_v24 = vld [vmem:[#allocation5 + $0x48] ss:$16 sps:$4 sm:$0xff]   ;;  %v1344_v16 = vld [vmem:[#allocation5 + $0x144] ss:$16 sps:$4 sm:$0xff]  }
 0x125   : > { %1171 = vmatpush3.bf16.msra.mxu0 %v1275_v62  ;;  %v1299_v23 = vld [vmem:[#allocation5 + $0x4c] ss:$16 sps:$4 sm:$0xff]   ;;  %v1303_v26 = vld [vmem:[#allocation5 + $0x68] ss:$16 sps:$4 sm:$0xff]   ;;  %v1290_v62 = vld [vmem:[#allocation5 + $0x24] ss:$16 sps:$4 sm:$0xff]  }
 0x126   : > { %1172 = vmatprep.subr.bf16.mxu0 %v1499_v61  ;;  %v1305_v25 = vld [vmem:[#allocation5 + $0x6c] ss:$16 sps:$4 sm:$0xff]   ;;  %v1309_v28 = vld [vmem:[#allocation5 + $0x88] ss:$16 sps:$4 sm:$0xff]   ;;  %v1342_v17 = vld [vmem:[#allocation5 + $0x140] ss:$16 sps:$4 sm:$0xff]  }
 0x127   : > { %v1311_v27 = vld [vmem:[#allocation5 + $0x8c] ss:$16 sps:$4 sm:$0xff]   ;;  %v1315_v30 = vld [vmem:[#allocation5 + $0xa8] ss:$16 sps:$4 sm:$0xff]   ;;  %v1350_v18 = vld [vmem:[#allocation5 + $0x164] ss:$16 sps:$4 sm:$0xff]  }
 0x128   : > { %v1317_v29 = vld [vmem:[#allocation5 + $0xac] ss:$16 sps:$4 sm:$0xff]   ;;  %v1321_v32 = vld [vmem:[#allocation5 + $0xc8] ss:$16 sps:$4 sm:$0xff]   ;;  %s1028_s19 = sshll.u32 (%p353_p2), %s1501_s18, 4  ;;  %s1029_s19 = int_to_ptr.vmem [resolvable:$true] %s1028_s19 }
 0x129   : > { %1173 = vmatpush3.bf16.msra.mxu0 %v1276_v63  ;;  %v1323_v31 = vld [vmem:[#allocation5 + $0xcc] ss:$16 sps:$4 sm:$0xff]   ;;  %v1327_v35 = vld [vmem:[#allocation5 + $0xe8] ss:$16 sps:$4 sm:$0xff]   ;;  %v1288_v63 = vld [vmem:[#allocation5 + $0x20] ss:$16 sps:$4 sm:$0xff]   ;;  %p1447_p4 = scmp.lt.s32.totalorder (%p353_p2), %s1029_s19, %s1029_s19 }
 0x12a   : > { %1174 = vmatprep.subr.bf16.mxu0 %v1499_v61  ;;  %v1329_v34 = vld [vmem:[#allocation5 + $0xec] ss:$16 sps:$4 sm:$0xff]   ;;  %v1333_v37 = vld [vmem:[#allocation5 + $0x108] ss:$16 sps:$4 sm:$0xff]   ;;  %s1442_s20 = scalar_lea.vmem (%p353_p2), %s1029_s19, 128 }
 0x12b   : > { %v1335_v36 = vld [vmem:[#allocation5 + $0x10c] ss:$16 sps:$4 sm:$0xff]   ;;  %v1339_v39 = vld [vmem:[#allocation5 + $0x128] ss:$16 sps:$4 sm:$0xff]   ;;  %p1443_p3 = scmp.ne.s32.totalorder (%p353_p2), %s1029_s19, %s1442_s20  ;;  %p1448_p5 = scmp.lt.s32.totalorder (%p353_p2), %s1442_s20, %s1442_s20 }
 0x12c   : > { %v1341_v38 = vld [vmem:[#allocation5 + $0x12c] ss:$16 sps:$4 sm:$0xff]   ;;  %v1345_v41 = vld [vmem:[#allocation5 + $0x148] ss:$16 sps:$4 sm:$0xff]  }
 0x12d   : > { %1175 = vmatpush3.bf16.msra.mxu0 %v1277_v0  ;;  %v1347_v40 = vld [vmem:[#allocation5 + $0x14c] ss:$16 sps:$4 sm:$0xff]   ;;  %v1351_v43 = vld [vmem:[#allocation5 + $0x168] ss:$16 sps:$4 sm:$0xff]   ;;  %v1296_v0 = vld [vmem:[#allocation5 + $0x44] ss:$16 sps:$4 sm:$0xff]   ;;  %p1449_p6 = por (%p353_p2), %p1448_p5, %p1447_p4 }
 0x12e   : > { %1176 = vmatprep.subr.bf16.mxu0 %v1499_v61  ;;  %v1353_v42 = vld [vmem:[#allocation5 + $0x16c] ss:$16 sps:$4 sm:$0xff]   ;;  %v1357_v45 = vld [vmem:[#allocation5 + $0x188] ss:$16 sps:$4 sm:$0xff]  }
 0x12f   : > { %v1359_v44 = vld [vmem:[#allocation5 + $0x18c] ss:$16 sps:$4 sm:$0xff]   ;;  %v1363_v47 = vld [vmem:[#allocation5 + $0x1a8] ss:$16 sps:$4 sm:$0xff]   ;;  %p1450_p7 = pnand (%p353_p2), %p1449_p6, %p1443_p3 }
 0x130   : > { %v1365_v46 = vld [vmem:[#allocation5 + $0x1ac] ss:$16 sps:$4 sm:$0xff]   ;;  %v1369_v51 = vld [vmem:[#allocation5 + $0x1c8] ss:$16 sps:$4 sm:$0xff]  }
 0x131   : > { %1177 = vmatpush3.bf16.msra.mxu0 %v1278_v1  ;;  %v1371_v50 = vld [vmem:[#allocation5 + $0x1cc] ss:$16 sps:$4 sm:$0xff]   ;;  %v1375_v55 = vld [vmem:[#allocation5 + $0x1e8] ss:$16 sps:$4 sm:$0xff]   ;;  %v1294_v1 = vld [vmem:[#allocation5 + $0x40] ss:$16 sps:$4 sm:$0xff]  }
 0x132   : > { %1178 = vmatprep.subr.bf16.mxu0 %v1499_v61  ;;  %v1377_v54 = vld [vmem:[#allocation5 + $0x1ec] ss:$16 sps:$4 sm:$0xff]  }
 0x135   : > { %1179 = vmatpush3.bf16.msra.mxu0 %v1279_v2  ;;  %v1302_v2 = vld [vmem:[#allocation5 + $0x64] ss:$16 sps:$4 sm:$0xff]  }
 0x136   : > { %1180 = vmatprep.subr.bf16.mxu0 %v1499_v61 }
 0x139   : > { %1181 = vmatpush3.bf16.msra.mxu0 %v1280_v3  ;;  %v1300_v3 = vld [vmem:[#allocation5 + $0x60] ss:$16 sps:$4 sm:$0xff]  }
 0x13a   : > { %1182 = vmatprep.subr.bf16.mxu0 %v1499_v61 }
 0x13d   : > { %1183 = vmatpush3.bf16.msra.mxu0 %v1281_v4  ;;  %v1308_v4 = vld [vmem:[#allocation5 + $0x84] ss:$16 sps:$4 sm:$0xff]  }
 0x13e   : > { %951 = vmatprep.subr.bf16.mxu0 %v1287_v20  ;;  %v1356_v20 = vld [vmem:[#allocation5 + $0x184] ss:$16 sps:$4 sm:$0xff]  }
 0x140   : > { %1185 = vmatmul.mubr.bf16.vlgmr.msra.gmra.mrb[0].mxu0 %v1617_v5 }
 0x141   : > { %983 = vmatprep.mubr.bf16.mxu0 %v1617_v5  ;;  %952 = vmatpush1.bf16.msra.mxu0 %v1285_v19  ;;  %v1348_v19 = vld [vmem:[#allocation5 + $0x160] ss:$16 sps:$4 sm:$0xff]  }
 0x142   : > { %953 = vmatprep.subr.bf16.mxu0 %v1293_v21  ;;  %v1354_v21 = vld [vmem:[#allocation5 + $0x180] ss:$16 sps:$4 sm:$0xff]  }
 0x145   : > { %954 = vmatpush1.bf16.msra.mxu0 %v1291_v22  ;;  %v1362_v22 = vld [vmem:[#allocation5 + $0x1a4] ss:$16 sps:$4 sm:$0xff]  }
 0x146   : > { %955 = vmatprep.subr.bf16.mxu0 %v1299_v23  ;;  %v1360_v23 = vld [vmem:[#allocation5 + $0x1a0] ss:$16 sps:$4 sm:$0xff]  }
 0x149   : > { %956 = vmatpush1.bf16.msra.mxu0 %v1297_v24  ;;  %v1368_v24 = vld [vmem:[#allocation5 + $0x1c4] ss:$16 sps:$4 sm:$0xff]  }
 0x14a   : > { %957 = vmatprep.subr.bf16.mxu0 %v1305_v25  ;;  %v1366_v25 = vld [vmem:[#allocation5 + $0x1c0] ss:$16 sps:$4 sm:$0xff]  }
 0x14d   : > { %958 = vmatpush1.bf16.msra.mxu0 %v1303_v26  ;;  %v1374_v26 = vld [vmem:[#allocation5 + $0x1e4] ss:$16 sps:$4 sm:$0xff]  }
 0x14e   : > { %959 = vmatprep.subr.bf16.mxu0 %v1311_v27  ;;  %v1372_v27 = vld [vmem:[#allocation5 + $0x1e0] ss:$16 sps:$4 sm:$0xff]  }
 0x151   : > { %960 = vmatpush1.bf16.msra.mxu0 %v1309_v28 }
 0x152   : > { %961 = vmatprep.subr.bf16.mxu0 %v1317_v29 }
 0x155   : > { %962 = vmatpush1.bf16.msra.mxu0 %v1315_v30 }
 0x156   : > { %963 = vmatprep.subr.bf16.mxu0 %v1323_v31 }
 0x159   : > { %964 = vmatpush1.bf16.msra.mxu0 %v1321_v32 }
 0x15a   : > { %965 = vmatprep.subr.bf16.mxu0 %v1329_v34 }
 0x15d   : > { %966 = vmatpush1.bf16.msra.mxu0 %v1327_v35 }
 0x15e   : > { %967 = vmatprep.subr.bf16.mxu0 %v1335_v36 }
 0x161   : > { %968 = vmatpush1.bf16.msra.mxu0 %v1333_v37 }
 0x162   : > { %969 = vmatprep.subr.bf16.mxu0 %v1341_v38 }
 0x165   : > { %970 = vmatpush1.bf16.msra.mxu0 %v1339_v39 }
 0x166   : > { %971 = vmatprep.subr.bf16.mxu0 %v1347_v40 }
 0x169   : > { %972 = vmatpush1.bf16.msra.mxu0 %v1345_v41 }
 0x16a   : > { %973 = vmatprep.subr.bf16.mxu0 %v1353_v42 }
 0x16d   : > { %974 = vmatpush1.bf16.msra.mxu0 %v1351_v43 }
 0x16e   : > { %975 = vmatprep.subr.bf16.mxu0 %v1359_v44 }
 0x171   : > { %976 = vmatpush1.bf16.msra.mxu0 %v1357_v45 }
 0x172   : > { %977 = vmatprep.subr.bf16.mxu0 %v1365_v46 }
 0x175   : > { %978 = vmatpush1.bf16.msra.mxu0 %v1363_v47 }
 0x176   : > { %979 = vmatprep.subr.bf16.mxu0 %v1371_v50 }
 0x179   : > { %980 = vmatpush1.bf16.msra.mxu0 %v1369_v51 }
 0x17a   : > { %981 = vmatprep.subr.bf16.mxu0 %v1377_v54 }
 0x17d   : > { %982 = vmatpush1.bf16.msra.mxu0 %v1375_v55 }
 0x213   : > { %v458_v6 = vpop.f32.mrb[0].mxu0 }
 0x214   : > { %v1186_v7 = vpop.f32.mrb[1].mxu0  ;;  %v465_v8 = vsel %vm464_vm1, %v458_v6, -inf }
 0x215   : > { %466 = vmax.xlane.f32.xlu0 %v465_v8  ;;  %v461_v9 = vpop.f32.mrb[2].mxu0  ;;  %v1314_v7 = vld [vmem:[#allocation5 + $0xa4] ss:$16 sps:$4 sm:$0xff]   ;;  %v1312_v8 = vld [vmem:[#allocation5 + $0xa0] ss:$16 sps:$4 sm:$0xff]  }
 0x216   : > { %v1187_v10 = vpop.f32.mrb[3].mxu0  ;;  %v1320_v9 = vld [vmem:[#allocation5 + $0xc4] ss:$16 sps:$4 sm:$0xff]  }
 0x217   : > { %v1326_v10 = vld [vmem:[#allocation5 + $0xe4] ss:$16 sps:$4 sm:$0xff]  }
 0x2a2   : > { %v467_v11 = vpop.xlane.xlu0 %466 }
 0x2a3   : > { %v468_v12 = vsub.f32 %v458_v6, %v467_v11  ;;  %v1306_v6 = vld [vmem:[#allocation5 + $0x80] ss:$16 sps:$4 sm:$0xff]  }
 0x2a4   : > { %v1324_v11 = vld [vmem:[#allocation5 + $0xe0] ss:$16 sps:$4 sm:$0xff]  }
 0x2a5   : > { %v469_v13 = vmul.f32 1.442695, %v468_v12  ;;  %v1332_v12 = vld [vmem:[#allocation5 + $0x104] ss:$16 sps:$4 sm:$0xff]  }
 0x2a7   : > { %1378 = vpow2.f32 %v469_v13  ;;  %v1330_v13 = vld [vmem:[#allocation5 + $0x100] ss:$16 sps:$4 sm:$0xff]  }
 0x2b1   : > { %v1622_v14 = vpop.eup %1378 }
 0x2b2   : > { %v471_v15 = vsel %vm464_vm1, %v1622_v14, 0.0 }
 0x2b3   : > { %472 = vadd.xlane.f32.xlu0 %v471_v15  ;;  %v1336_v15 = vld [vmem:[#allocation5 + $0x120] ss:$16 sps:$4 sm:$0xff]  }
 0x340   : > { %v473_v56 = vpop.xlane.xlu0 %472 }
 0x341   : > { %1380 = vrcp.f32 %v473_v56 }
 0x34b   : > { %v1381_v57 = vpop.eup %1380 }
 0x34c   : > { %v475_v59 = vmul.f32 %v1381_v57, %v1622_v14  ;;  %v1338_v14 = vld [vmem:[#allocation5 + $0x124] ss:$16 sps:$4 sm:$0xff]  }
 0x34e   : > { %v476_v61 = vpack.c.bf16 %v475_v59, %v475_v59 }
 0x350   : > { %1191 = vmatmul.mubr.msk.bf16.vlgmr.msra.gmra.mrb[0].mxu1 %vm464_vm1, %v476_v61 }
 0x351   : > { %911 = vmatpush1.bf16.msra.mxu1 %v1282_v60  ;;  %942 = vmatprep.mubr.bf16.mxu1 %v1617_v5  ;;  %v1318_v5 = vld [vmem:[#allocation5 + $0xc0] ss:$16 sps:$4 sm:$0xff]  }
 0x352   : > { %912 = vmatprep.subr.bf16.mxu1 %v1290_v62 }
 0x355   : > { %913 = vmatpush1.bf16.msra.mxu1 %v1288_v63 }
 0x356   : > { %914 = vmatprep.subr.bf16.mxu1 %v1296_v0 }
 0x359   : > { %915 = vmatpush1.bf16.msra.mxu1 %v1294_v1 }
 0x35a   : > { %916 = vmatprep.subr.bf16.mxu1 %v1302_v2 }
 0x35d   : > { %917 = vmatpush1.bf16.msra.mxu1 %v1300_v3 }
 0x35e   : > { %918 = vmatprep.subr.bf16.mxu1 %v1308_v4 }
 0x361   : > { %919 = vmatpush1.bf16.msra.mxu1 %v1306_v6 }
 0x362   : > { %920 = vmatprep.subr.bf16.mxu1 %v1314_v7 }
 0x365   : > { %921 = vmatpush1.bf16.msra.mxu1 %v1312_v8 }
 0x366   : > { %922 = vmatprep.subr.bf16.mxu1 %v1320_v9 }
 0x369   : > { %923 = vmatpush1.bf16.msra.mxu1 %v1318_v5 }
 0x36a   : > { %924 = vmatprep.subr.bf16.mxu1 %v1326_v10 }
 0x36d   : > { %925 = vmatpush1.bf16.msra.mxu1 %v1324_v11 }
 0x36e   : > { %926 = vmatprep.subr.bf16.mxu1 %v1332_v12 }
 0x371   : > { %927 = vmatpush1.bf16.msra.mxu1 %v1330_v13 }
 0x372   : > { %928 = vmatprep.subr.bf16.mxu1 %v1338_v14 }
 0x375   : > { %929 = vmatpush1.bf16.msra.mxu1 %v1336_v15 }
 0x376   : > { %930 = vmatprep.subr.bf16.mxu1 %v1344_v16 }
 0x379   : > { %931 = vmatpush1.bf16.msra.mxu1 %v1342_v17 }
 0x37a   : > { %932 = vmatprep.subr.bf16.mxu1 %v1350_v18 }
 0x37d   : > { %933 = vmatpush1.bf16.msra.mxu1 %v1348_v19 }
 0x37e   : > { %934 = vmatprep.subr.bf16.mxu1 %v1356_v20 }
 0x381   : > { %935 = vmatpush1.bf16.msra.mxu1 %v1354_v21 }
 0x382   : > { %936 = vmatprep.subr.bf16.mxu1 %v1362_v22 }
 0x385   : > { %937 = vmatpush1.bf16.msra.mxu1 %v1360_v23 }
 0x386   : > { %938 = vmatprep.subr.bf16.mxu1 %v1368_v24 }
 0x389   : > { %939 = vmatpush1.bf16.msra.mxu1 %v1366_v25 }
 0x38a   : > { %940 = vmatprep.subr.bf16.mxu1 %v1374_v26 }
 0x38d   : > { %941 = vmatpush1.bf16.msra.mxu1 %v1372_v27 }
 0x423   : > { %v519_v28 = vpop.f32.mrb[0].mxu1 }
 0x424   : > { %v525_v29 = vpack.c.bf16 %v519_v28, %v519_v28  ;;  %v1192_v30 = vpop.f32.mrb[1].mxu1 }
 0x425   : > { %v522_v31 = vpop.f32.mrb[2].mxu1 }
 0x426   : > { %v1193_v32 = vpop.f32.mrb[3].mxu1  ;;  %943 = vmatmul.mubr.bf16.vlgmr.msra.gmra.mrb[4].mxu1 %v525_v29  ;;  %984 = vmatmul.mubr.bf16.vlgmr.msra.gmra.mrb[4].mxu0 %v525_v29 }
 0x4f9   : > { %v944_v34 = vpop.f32.mrb[4].mxu1  ;;  %v985_v35 = vpop.f32.mrb[4].mxu0 }
 0x4fa   : > { %v992_v36 = vadd.f32 %v944_v34, %v1571_v48  ;;  %v946_v37 = vpop.f32.mrb[5].mxu1  ;;  %v987_v38 = vpop.f32.mrb[5].mxu0  ;;  %v994_v50 = vadd.f32 %v985_v35, %v1573_v49 }
 0x4fb   : > { %v993_v39 = vadd.f32 %v946_v37, %v1575_v52  ;;  %v948_v40 = vpop.f32.mrb[6].mxu1  ;;  %v989_v41 = vpop.f32.mrb[6].mxu0  ;;  %v995_v46 = vadd.f32 %v987_v38, %v1577_v53 }
 0x4fc   : > { %v1154_v42 = vmul.f32 -1.442695, %v992_v36  ;;  %v949_v43 = vpop.f32.mrb[7].mxu1  ;;  %v990_v44 = vpop.f32.mrb[7].mxu0 }
 0x4fd   : > { %v1155_v45 = vmul.f32 -1.442695, %v993_v39  ;;  %v1156_v47 = vmul.f32 -1.442695, %v995_v46 }
 0x4fe   : > { %1382 = vpow2.f32 %v1154_v42 }
 0x4ff   : > { %1384 = vpow2.f32 %v1155_v45 }
 0x500   : > { %1386 = vpow2.f32 %v1156_v47 }
 0x501   : > { %1388 = vtanh.f32 %v994_v50 }
 0x508   : > { %v1383_v51 = vpop.eup %1382 }
 0x509   : > { %v1385_v54 = vpop.eup %1384  ;;  %v999_v55 = vadd.f32 1.0, %v1383_v51 }
 0x50a   : > { %v1005_v56 = vadd.f32 1.0, %v1385_v54  ;;  %v1387_v57 = vpop.eup %1386 }
 0x50b   : > { %1390 = vrcp.f32 %v999_v55  ;;  %v1389_v59 = vpop.eup %1388  ;;  %v1012_v63 = vadd.f32 1.0, %v1387_v57 }
 0x50c   : > { %1392 = vrcp.f32 %v1005_v56 }
 0x50d   : > { %1394 = vrcp.f32 %v1012_v63 }
 0x515   : > { %v1391_v60 = vpop.eup %1390 }
 0x516   : > { %v1393_v61 = vpop.eup %1392  ;;  %v1016_v62 = vmul.f32 %v1391_v60, %v1389_v59 }
 0x517   : > { %v1015_v0 = vmul.f32 %v1484_v58, %v1393_v61  ;;  %v1395_v1 = vpop.eup %1394 }
 0x519   : > { %v1017_v58 = vadd.f32 %v1016_v62, %v1015_v0  }
 0x51b   : > { %1396 = vtanh.f32 %v1017_v58 }
 0x524   :  { %355 = sbr.rel (!%p353_p2) target bundleno = 287 (0x11f), region = 59 }
 0x525   : > { %v1397_v2 = vpop.eup %1396 }
 0x526   : > { %v1019_v3 = vmul.f32 %v1397_v2, %v1395_v1 }
 0x528   : > { %v1020_v4 = vadd.f32 %v1019_v3, %v1564_v33  }
 0x52a   : > { %v1665_v59 = vmov %v1020_v4  ;;  %1021 = vst [vmem:[#allocation7] sm:$0xff] (%p353_p2), %v1020_v4 }
 0x52b   :  { %1453 = shalt.err (!%p1450_p7)
}
 0x52c   :  { %s1454_s4 = scalar_lea.hbm %s1663_s6, 128 }
 0x52d   :  { %p1455_p8 = scmp.ne.s32.totalorder %s1663_s6, %s1454_s4  ;;  %p1458_p9 = scmp.lt.u32.totalorder %s1454_s4, %s1663_s6 }
 0x52f   :  { %p1460_p10 = pnand %p1458_p9, %p1455_p8 }
 0x531   :  { %1463 = shalt.err (!%p1460_p10)
}
 0x532   :  { %1031 = dma.vmem_to_hbm [thread:$0]  %s1029_s19, 128, %s1663_s6, [#allocation4]  }
 0x533   :  { %1480 = dma.done.wait [#allocation4], 128  }
 0x534   :  { %1481 = vsyncadd [#allocation4], 4294967168 }
 0x535   :  { %1035 = vsyncpa [#allocation3], 1 }
 0x536   :  { %1036 = vsyncpa [#allocation6], 1 }
 0x537   :  { %1037 = vsyncpa [#allocation4], 1 }

</bundles_post_ra>
